<compile_context>
chip_gen: v7x
topology: tpu7x:2x2x1
jax: 0.10.0
libtpu: 0.0.40
codegen_flags: <defaults>
</compile_context>

<pallas_src>
import functools

import jax
import jax.numpy as jnp
from jax.experimental import pallas as pl
from jax.experimental.pallas import tpu as pltpu

LAYER_DIMS = [300, 300, 200, 100, 50, 10]  # matches the nn.Linear chain
_LANE = 128
_SUBLANE = 8


def _round_up(n, m):
    return (n + m - 1) // m * m


def _bf16_activation_default():
    """bf16 tanh/bias-add only where the VPU/EUP are bf16-native (v6e, v7x)."""
    try:
        kind = jax.devices()[0].device_kind.lower()
        return ("v6" in kind) or ("v7" in kind)
    except Exception:
        return False


def _mlp_kernel(*refs, out_widths, act_dtype):
    # refs = (x, w0..w5, bias, out)
    n_layers = len(out_widths)
    x_ref = refs[0]
    w_refs = refs[1:1 + n_layers]
    b_ref = refs[1 + n_layers]
    out_ref = refs[-1]

    h = x_ref[...]                                     # [bb, nin_p] f32
    off = 0
    for w_ref, width in zip(w_refs, out_widths):
        b = b_ref[:, off:off + width]                  # [1, width] f32, static 128-aligned slice
        acc = jnp.dot(h.astype(jnp.bfloat16), w_ref[...],   # bf16 x bf16 -> f32 on the MXU
                      preferred_element_type=jnp.float32)
        h = jnp.tanh((acc + b).astype(act_dtype))      # tanh on EUP; bf16 h on v6e/v7x
        off += width
    out_ref[...] = h.astype(out_ref.dtype)             # [bb, 128] lane-dense store


def multiple_layer_network(x, weights, biases, *, batch_block=1024,
                           bf16_activations=None):
    """x: [B, nin] f32.  weights[i]: [in_i, out_i] f32.  biases[i]: [1, out_i] f32."""
    B, nin = x.shape
    out_dim = weights[-1].shape[1]

    if bf16_activations is None:
        bf16_activations = _bf16_activation_default()
    act_dtype = jnp.bfloat16 if bf16_activations else jnp.float32

    # Feature dims: x only needs sublane (8) alignment; hidden layers pad to 128 lanes.
    nin_p = _round_up(nin, _SUBLANE)
    in_pad = [nin_p] + [_round_up(d, _LANE) for d in LAYER_DIMS[:-1]]
    out_pad = [_round_up(d, _LANE) for d in LAYER_DIMS]

    # Pad params with exact zeros; weights -> bf16, fused bias buffer -> f32.
    w_padded = []
    for w, ip, op in zip(weights, in_pad, out_pad):
        if w.shape == (ip, op):
            wp = w.astype(jnp.float32)
        else:
            wp = jnp.zeros((ip, op), jnp.float32).at[: w.shape[0], : w.shape[1]].set(w)
        w_padded.append(wp.astype(jnp.bfloat16))
    b_padded = jnp.concatenate(
        [jnp.zeros((1, op), jnp.float32).at[:, : b.shape[1]].set(b)
         for b, op in zip(biases, out_pad)],
        axis=1)                                        # [1, sum(out_pad)] f32

    # Batch tiling; only materialize a padded copy of x if shapes actually change.
    bb = min(_round_up(batch_block, _SUBLANE), _round_up(B, _SUBLANE))
    Bp = _round_up(B, bb)
    if (Bp, nin_p) == x.shape:
        x_p = x
    else:
        x_p = jnp.zeros((Bp, nin_p), x.dtype).at[:B, :nin].set(x)

    grid = (Bp // bb,)
    resident = lambda i: (0, 0)                        # params stay in VMEM across steps
    in_specs = [pl.BlockSpec((bb, nin_p), lambda i: (i, 0))]
    in_specs += [pl.BlockSpec(w.shape, resident) for w in w_padded]
    in_specs += [pl.BlockSpec(b_padded.shape, resident)]
    out_specs = pl.BlockSpec((bb, out_pad[-1]), lambda i: (i, 0))

    kernel = functools.partial(_mlp_kernel, out_widths=tuple(out_pad),
                               act_dtype=act_dtype)
    out_p = pl.pallas_call(
        kernel,
        out_shape=jax.ShapeDtypeStruct((Bp, out_pad[-1]), x.dtype),
        grid_spec=pltpu.PrefetchScalarGridSpec(
            num_scalar_prefetch=0, grid=grid,
            in_specs=in_specs, out_specs=out_specs),
        compiler_params=pltpu.CompilerParams(
            # On v7x consider pltpu.CORE_PARALLEL here (needs grid >= 2 steps).
            dimension_semantics=("parallel",)),
    )(x_p, *w_padded, b_padded)

    return out_p[:B, :out_dim]


def init_params(key, nin):
    """Deterministic init mimicking PyTorch Linear's U(-1/sqrt(fan_in), +1/sqrt(fan_in))."""
    dims = [nin] + LAYER_DIMS
    weights, biases = [], []
    for i in range(len(LAYER_DIMS)):
        fan_in, fan_out = dims[i], dims[i + 1]
        key, kw, kb = jax.random.split(key, 3)
        bound = 1.0 / jnp.sqrt(fan_in)
        # Stored as [in, out] (transpose of PyTorch's [out, in]).
        w = jax.random.uniform(kw, (fan_in, fan_out), jnp.float32, -bound, bound)
        b = jax.random.uniform(kb, (1, fan_out), jnp.float32, -bound, bound)
        weights.append(w)
        biases.append(b)
    return weights, biases


def reference_forward(x, weights, biases, *, bf16_activations=None):
    """Pure-JAX reference using the same precision recipe as the kernel
    (bf16 matmul operands, f32 accumulation, act_dtype tanh)."""
    if bf16_activations is None:
        bf16_activations = _bf16_activation_default()
    act_dtype = jnp.bfloat16 if bf16_activations else jnp.float32
    h = x
    for w, b in zip(weights, biases):
        acc = jnp.dot(h.astype(jnp.bfloat16), w.astype(jnp.bfloat16),
                      preferred_element_type=jnp.float32) + b
        h = jnp.tanh(acc.astype(act_dtype))
    return h.astype(jnp.float32)


if __name__ == "__main__":
    key = jax.random.PRNGKey(0)
    nin = 32

    key, kx = jax.random.split(key)
    weights, biases = init_params(key, nin)

    # Small batch (single grid step).
    x = jax.random.normal(kx, (8, nin), jnp.float32)
    out = jax.block_until_ready(multiple_layer_network(x, weights, biases))
    ref = reference_forward(x, weights, biases)
    assert out.shape == (8, 10), out.shape
    assert jnp.allclose(out, ref, atol=1e-2, rtol=1e-2), "mismatch vs reference (B=8)"

    # Larger, non-multiple batch with >1 grid steps (exercises pipelining + batch padding).
    key, kx2 = jax.random.split(key)
    x2 = jax.random.normal(kx2, (20, nin), jnp.float32)
    out2 = jax.block_until_ready(
        multiple_layer_network(x2, weights, biases, batch_block=16))
    ref2 = reference_forward(x2, weights, biases)
    assert out2.shape == (20, 10), out2.shape
    assert jnp.allclose(out2, ref2, atol=1e-2, rtol=1e-2), "mismatch vs reference (B=20)"

    print("KERNEL_OK")
</pallas_src>

<mosaic_0001>
module attributes {stable_mosaic.version = 11 : i64} {
  func.func @_mlp_kernel(%arg0: i32, %arg1: memref<8x32xf32, #tpu.memory_space<vmem>>, %arg2: memref<32x384xbf16, #tpu.memory_space<vmem>>, %arg3: memref<384x384xbf16, #tpu.memory_space<vmem>>, %arg4: memref<384x256xbf16, #tpu.memory_space<vmem>>, %arg5: memref<256x128xbf16, #tpu.memory_space<vmem>>, %arg6: memref<128x128xbf16, #tpu.memory_space<vmem>>, %arg7: memref<128x128xbf16, #tpu.memory_space<vmem>>, %arg8: memref<1x1408xf32, #tpu.memory_space<vmem>>, %arg9: memref<8x128xf32, #tpu.memory_space<vmem>>) attributes {dimension_semantics = [#tpu.dimension_semantics<parallel>], iteration_bounds = array<i64: 1>, scalar_prefetch = 0 : i64, scratch_operands = 0 : i64, tpu.core_type = #tpu.core_type<tc>, window_params = [{transform_indices = @transform_0, window_bounds = array<i64: 8, 32>}, {pipeline_mode = #tpu.pipeline_mode<synchronous>, transform_indices = @transform_1, window_bounds = array<i64: 32, 384>}, {pipeline_mode = #tpu.pipeline_mode<synchronous>, transform_indices = @transform_2, window_bounds = array<i64: 384, 384>}, {pipeline_mode = #tpu.pipeline_mode<synchronous>, transform_indices = @transform_3, window_bounds = array<i64: 384, 256>}, {pipeline_mode = #tpu.pipeline_mode<synchronous>, transform_indices = @transform_4, window_bounds = array<i64: 256, 128>}, {pipeline_mode = #tpu.pipeline_mode<synchronous>, transform_indices = @transform_5, window_bounds = array<i64: 128, 128>}, {pipeline_mode = #tpu.pipeline_mode<synchronous>, transform_indices = @transform_6, window_bounds = array<i64: 128, 128>}, {pipeline_mode = #tpu.pipeline_mode<synchronous>, transform_indices = @transform_7, window_bounds = array<i64: 1, 1408>}, {transform_indices = @transform_8, window_bounds = array<i64: 8, 128>}]} {
    %c0 = arith.constant 0 : index
    %c0_0 = arith.constant 0 : index
    %0 = vector.load %arg1[%c0, %c0_0] : memref<8x32xf32, #tpu.memory_space<vmem>>, vector<8x32xf32>
    %c0_1 = arith.constant 0 : index
    %c0_2 = arith.constant 0 : index
    %1 = vector.load %arg8[%c0_1, %c0_2] : memref<1x1408xf32, #tpu.memory_space<vmem>>, vector<1x384xf32>
    %2 = arith.truncf %0 : vector<8x32xf32> to vector<8x32xbf16>
    %c0_3 = arith.constant 0 : index
    %c0_4 = arith.constant 0 : index
    %3 = vector.load %arg2[%c0_3, %c0_4] : memref<32x384xbf16, #tpu.memory_space<vmem>>, vector<32x384xbf16>
    %cst = arith.constant dense<0.000000e+00> : vector<8x384xf32>
    %4 = tpu.matmul %2, %3, %cst {dimension_numbers = #tpu.dot_dimension_numbers<[1], [0], [0], [1], [0, 0, 1, 1], [], []>} : vector<8x32xbf16>, vector<32x384xbf16>, vector<8x384xf32> -> vector<8x384xf32>
    %5 = vector.broadcast %1 : vector<1x384xf32> to vector<8x384xf32>
    %6 = arith.addf %4, %5 : vector<8x384xf32>
    %7 = math.tanh %6 : vector<8x384xf32>
    %c0_5 = arith.constant 0 : index
    %c384 = arith.constant 384 : index
    %8 = vector.load %arg8[%c0_5, %c384] : memref<1x1408xf32, #tpu.memory_space<vmem>>, vector<1x384xf32>
    %9 = arith.truncf %7 : vector<8x384xf32> to vector<8x384xbf16>
    %c0_6 = arith.constant 0 : index
    %c0_7 = arith.constant 0 : index
    %10 = vector.load %arg3[%c0_6, %c0_7] : memref<384x384xbf16, #tpu.memory_space<vmem>>, vector<384x384xbf16>
    %cst_8 = arith.constant dense<0.000000e+00> : vector<8x384xf32>
    %11 = tpu.matmul %9, %10, %cst_8 {dimension_numbers = #tpu.dot_dimension_numbers<[1], [0], [0], [1], [0, 0, 1, 1], [], []>} : vector<8x384xbf16>, vector<384x384xbf16>, vector<8x384xf32> -> vector<8x384xf32>
    %12 = vector.broadcast %8 : vector<1x384xf32> to vector<8x384xf32>
    %13 = arith.addf %11, %12 : vector<8x384xf32>
    %14 = math.tanh %13 : vector<8x384xf32>
    %c0_9 = arith.constant 0 : index
    %c768 = arith.constant 768 : index
    %15 = vector.load %arg8[%c0_9, %c768] : memref<1x1408xf32, #tpu.memory_space<vmem>>, vector<1x256xf32>
    %16 = arith.truncf %14 : vector<8x384xf32> to vector<8x384xbf16>
    %c0_10 = arith.constant 0 : index
    %c0_11 = arith.constant 0 : index
    %17 = vector.load %arg4[%c0_10, %c0_11] : memref<384x256xbf16, #tpu.memory_space<vmem>>, vector<384x256xbf16>
    %cst_12 = arith.constant dense<0.000000e+00> : vector<8x256xf32>
    %18 = tpu.matmul %16, %17, %cst_12 {dimension_numbers = #tpu.dot_dimension_numbers<[1], [0], [0], [1], [0, 0, 1, 1], [], []>} : vector<8x384xbf16>, vector<384x256xbf16>, vector<8x256xf32> -> vector<8x256xf32>
    %19 = vector.broadcast %15 : vector<1x256xf32> to vector<8x256xf32>
    %20 = arith.addf %18, %19 : vector<8x256xf32>
    %21 = math.tanh %20 : vector<8x256xf32>
    %c0_13 = arith.constant 0 : index
    %c1024 = arith.constant 1024 : index
    %22 = vector.load %arg8[%c0_13, %c1024] : memref<1x1408xf32, #tpu.memory_space<vmem>>, vector<1x128xf32>
    %23 = arith.truncf %21 : vector<8x256xf32> to vector<8x256xbf16>
    %c0_14 = arith.constant 0 : index
    %c0_15 = arith.constant 0 : index
    %24 = vector.load %arg5[%c0_14, %c0_15] : memref<256x128xbf16, #tpu.memory_space<vmem>>, vector<256x128xbf16>
    %cst_16 = arith.constant dense<0.000000e+00> : vector<8x128xf32>
    %25 = tpu.matmul %23, %24, %cst_16 {dimension_numbers = #tpu.dot_dimension_numbers<[1], [0], [0], [1], [0, 0, 1, 1], [], []>} : vector<8x256xbf16>, vector<256x128xbf16>, vector<8x128xf32> -> vector<8x128xf32>
    %26 = vector.broadcast %22 : vector<1x128xf32> to vector<8x128xf32>
    %27 = arith.addf %25, %26 : vector<8x128xf32>
    %28 = math.tanh %27 : vector<8x128xf32>
    %c0_17 = arith.constant 0 : index
    %c1152 = arith.constant 1152 : index
    %29 = vector.load %arg8[%c0_17, %c1152] : memref<1x1408xf32, #tpu.memory_space<vmem>>, vector<1x128xf32>
    %30 = arith.truncf %28 : vector<8x128xf32> to vector<8x128xbf16>
    %c0_18 = arith.constant 0 : index
    %c0_19 = arith.constant 0 : index
    %31 = vector.load %arg6[%c0_18, %c0_19] : memref<128x128xbf16, #tpu.memory_space<vmem>>, vector<128x128xbf16>
    %cst_20 = arith.constant dense<0.000000e+00> : vector<8x128xf32>
    %32 = tpu.matmul %30, %31, %cst_20 {dimension_numbers = #tpu.dot_dimension_numbers<[1], [0], [0], [1], [0, 0, 1, 1], [], []>} : vector<8x128xbf16>, vector<128x128xbf16>, vector<8x128xf32> -> vector<8x128xf32>
    %33 = vector.broadcast %29 : vector<1x128xf32> to vector<8x128xf32>
    %34 = arith.addf %32, %33 : vector<8x128xf32>
    %35 = math.tanh %34 : vector<8x128xf32>
    %c0_21 = arith.constant 0 : index
    %c1280 = arith.constant 1280 : index
    %36 = vector.load %arg8[%c0_21, %c1280] : memref<1x1408xf32, #tpu.memory_space<vmem>>, vector<1x128xf32>
    %37 = arith.truncf %35 : vector<8x128xf32> to vector<8x128xbf16>
    %c0_22 = arith.constant 0 : index
    %c0_23 = arith.constant 0 : index
    %38 = vector.load %arg7[%c0_22, %c0_23] : memref<128x128xbf16, #tpu.memory_space<vmem>>, vector<128x128xbf16>
    %cst_24 = arith.constant dense<0.000000e+00> : vector<8x128xf32>
    %39 = tpu.matmul %37, %38, %cst_24 {dimension_numbers = #tpu.dot_dimension_numbers<[1], [0], [0], [1], [0, 0, 1, 1], [], []>} : vector<8x128xbf16>, vector<128x128xbf16>, vector<8x128xf32> -> vector<8x128xf32>
    %40 = vector.broadcast %36 : vector<1x128xf32> to vector<8x128xf32>
    %41 = arith.addf %39, %40 : vector<8x128xf32>
    %42 = math.tanh %41 : vector<8x128xf32>
    %c0_25 = arith.constant 0 : index
    %c0_26 = arith.constant 0 : index
    %43 = vector.load %arg9[%c0_25, %c0_26] : memref<8x128xf32, #tpu.memory_space<vmem>>, vector<8x128xf32>
    tpu.vector_store %arg9[%c0_25, %c0_26], %42 {strides = array<i32>} : memref<8x128xf32, #tpu.memory_space<vmem>>, vector<8x128xf32>,
    return
  }
  func.func @transform_0(%arg0: i32) -> (i32, i32) {
    %c0_i32 = arith.constant 0 : i32
    %c0_i32_0 = arith.constant 0 : i32
    return %arg0, %c0_i32 : i32, i32
  }
  func.func @transform_1(%arg0: i32) -> (i32, i32) {
    %c0_i32 = arith.constant 0 : i32
    %c0_i32_0 = arith.constant 0 : i32
    %c0_i32_1 = arith.constant 0 : i32
    return %c0_i32, %c0_i32_0 : i32, i32
  }
  func.func @transform_2(%arg0: i32) -> (i32, i32) {
    %c0_i32 = arith.constant 0 : i32
    %c0_i32_0 = arith.constant 0 : i32
    %c0_i32_1 = arith.constant 0 : i32
    return %c0_i32, %c0_i32_0 : i32, i32
  }
  func.func @transform_3(%arg0: i32) -> (i32, i32) {
    %c0_i32 = arith.constant 0 : i32
    %c0_i32_0 = arith.constant 0 : i32
    %c0_i32_1 = arith.constant 0 : i32
    return %c0_i32, %c0_i32_0 : i32, i32
  }
  func.func @transform_4(%arg0: i32) -> (i32, i32) {
    %c0_i32 = arith.constant 0 : i32
    %c0_i32_0 = arith.constant 0 : i32
    %c0_i32_1 = arith.constant 0 : i32
    return %c0_i32, %c0_i32_0 : i32, i32
  }
  func.func @transform_5(%arg0: i32) -> (i32, i32) {
    %c0_i32 = arith.constant 0 : i32
    %c0_i32_0 = arith.constant 0 : i32
    %c0_i32_1 = arith.constant 0 : i32
    return %c0_i32, %c0_i32_0 : i32, i32
  }
  func.func @transform_6(%arg0: i32) -> (i32, i32) {
    %c0_i32 = arith.constant 0 : i32
    %c0_i32_0 = arith.constant 0 : i32
    %c0_i32_1 = arith.constant 0 : i32
    return %c0_i32, %c0_i32_0 : i32, i32
  }
  func.func @transform_7(%arg0: i32) -> (i32, i32) {
    %c0_i32 = arith.constant 0 : i32
    %c0_i32_0 = arith.constant 0 : i32
    %c0_i32_1 = arith.constant 0 : i32
    return %c0_i32, %c0_i32_0 : i32, i32
  }
  func.func @transform_8(%arg0: i32) -> (i32, i32) {
    %c0_i32 = arith.constant 0 : i32
    %c0_i32_0 = arith.constant 0 : i32
    return %arg0, %c0_i32 : i32, i32
  }
}

</mosaic_0001>

<bundles_post_ra>
// kernel: tpu_custom_call.1
= control target key start
LH: loop header
LB: loop body
LE: loop exit
PB: predicated region body
PF: predicated region fallthrough
CT: control target
= control target key end

     0   :  { %13 = vsyncpa [#allocation3], 0  ;;  %s2752_s0 = inlined_call_operand.hbm [shape: f32[8,32], index: 0, kind: input, shape index: {}]   ;;  %s2753_s1 = inlined_call_operand.hbm [shape: bf16[32,384], index: 1, kind: input, shape index: {}]   ;;  %s2754_s2 = inlined_call_operand.hbm [shape: bf16[384,384], index: 2, kind: input, shape index: {}]   ;;  %s2755_s3 = inlined_call_operand.hbm [shape: bf16[384,256], index: 3, kind: input, shape index: {}]   ;;  %s2756_s4 = inlined_call_operand.hbm [shape: bf16[256,128], index: 4, kind: input, shape index: {}]   ;;  %s2757_s5 = inlined_call_operand.hbm [shape: bf16[128,128], index: 5, kind: input, shape index: {}]   ;;  %s2758_s6 = inlined_call_operand.hbm [shape: bf16[128,128], index: 6, kind: input, shape index: {}]   ;;  %s2759_s7 = inlined_call_operand.vmem [shape: f32[1,1408], index: 7, kind: input, shape index: {}]   ;;  %s2760_s8 = inlined_call_operand.hbm [shape: f32[8,128], index: 8, kind: output, shape index: {}]  }
   0x1   :  { %14 = vsyncpa [#allocation6], 0 }
   0x2   :  { %15 = vsyncpa [#allocation9], 0 }
   0x3   :  { %16 = vsyncpa [#allocation12], 0 }
   0x4   :  { %17 = vsyncpa [#allocation4], 0  ;;  %s2496_s27 = smov [#allocation5]   ;;  %s2310_s9 = scalar_lea.hbm %s2753_s1, 768 }
   0x5   :  { %s33_s28 = sshll.u32 %s2496_s27, 4  ;;  %p2311_p0 = scmp.ne.s32.totalorder %s2753_s1, %s2310_s9  ;;  %s34_s28 = int_to_ptr.vmem [resolvable:$true] %s33_s28 }
   0x6   :  { %p2314_p1 = scmp.lt.u32.totalorder %s2310_s9, %s2753_s1 }
   0x8   :  { %p2316_p2 = pnand %p2314_p1, %p2311_p0 }
   0xa   :  { %2319 = shalt.err (!%p2316_p2)
}
   0xb   :  { %s2320_s14 = scalar_lea.vmem %s34_s28, 768  ;;  %p2325_p4 = scmp.lt.s32.totalorder %s34_s28, %s34_s28 }
   0xc   :  { %p2321_p3 = scmp.ne.s32.totalorder %s34_s28, %s2320_s14  ;;  %p2326_p5 = scmp.lt.s32.totalorder %s2320_s14, %s2320_s14 }
   0xe   :  { %p2327_p6 = por %p2326_p5, %p2325_p4 }
  0x10   :  { %p2328_p7 = pnand %p2327_p6, %p2321_p3 }
  0x12   :  { %2331 = shalt.err (!%p2328_p7)
}
  0x13   :  { %s2497_s15 = smov 192   ;;  %s2498_s16 = smov 12  }
  0x14   :  { %39 = dma.hbm_to_vmem [thread:$0]  %s2753_s1, 768, %s34_s28, [#allocation6], %s2497_s15, %s2497_s15, %s2498_s16  }
  0x15   :  { %s2499_s19 = smov [#allocation8]   ;;  %s2332_s23 = scalar_lea.hbm %s2755_s3, 6144 }
  0x16   :  { %s57_s20 = sshll.u32 %s2499_s19, 4  ;;  %p2333_p8 = scmp.ne.s32.totalorder %s2755_s3, %s2332_s23  ;;  %s58_s20 = int_to_ptr.vmem [resolvable:$true] %s57_s20 }
  0x17   :  { %p2336_p9 = scmp.lt.u32.totalorder %s2332_s23, %s2755_s3 }
  0x19   :  { %p2338_p10 = pnand %p2336_p9, %p2333_p8 }
  0x1b   :  { %2341 = shalt.err (!%p2338_p10)
}
  0x1c   :  { %s2342_s29 = scalar_lea.vmem %s58_s20, 6144  ;;  %p2347_p12 = scmp.lt.s32.totalorder %s58_s20, %s58_s20 }
  0x1d   :  { %p2343_p11 = scmp.ne.s32.totalorder %s58_s20, %s2342_s29  ;;  %p2348_p13 = scmp.lt.s32.totalorder %s2342_s29, %s2342_s29 }
  0x1f   :  { %p2349_p0 = por %p2348_p13, %p2347_p12 }
  0x21   :  { %p2350_p1 = pnand %p2349_p0, %p2343_p11 }
  0x23   :  { %2353 = shalt.err (!%p2350_p1)
}
  0x24   :  { %s2500_s1 = smov 128   ;;  %s2501_s28 = smov 8  }
  0x25   :  { %63 = dma.hbm_to_vmem [thread:$0]  %s2755_s3, 6144, %s58_s20, [#allocation9], %s2500_s1, %s2500_s1, %s2501_s28  }
  0x26   :  { %s2502_s10 = smov [#allocation11]   ;;  %s2503_s12 = smov [#allocation2]  }
  0x27   :  { %s81_s11 = sshll.u32 %s2502_s10, 4  ;;  %s24_s13 = sshll.u32 %s2503_s12, 4  ;;  %s82_s11 = int_to_ptr.vmem [resolvable:$true] %s81_s11  ;;  %s25_s13 = int_to_ptr.vmem [resolvable:$true] %s24_s13 }
  0x28   :  { %s2354_s18 = scalar_lea.hbm %s2757_s5, 1024 }
  0x29   :  { %p2355_p2 = scmp.ne.s32.totalorder %s2757_s5, %s2354_s18  ;;  %p2358_p3 = scmp.lt.u32.totalorder %s2354_s18, %s2757_s5 }
  0x2b   :  { %p2360_p4 = pnand %p2358_p3, %p2355_p2 }
  0x2d   :  { %2363 = shalt.err (!%p2360_p4)
}
  0x2e   :  { %s2364_s3 = scalar_lea.vmem %s82_s11, 1024  ;;  %p2369_p6 = scmp.lt.s32.totalorder %s82_s11, %s82_s11 }
  0x2f   :  { %p2365_p5 = scmp.ne.s32.totalorder %s82_s11, %s2364_s3  ;;  %p2370_p7 = scmp.lt.s32.totalorder %s2364_s3, %s2364_s3 }
  0x31   :  { %p2371_p8 = por %p2370_p7, %p2369_p6 }
  0x33   :  { %p2372_p9 = pnand %p2371_p8, %p2365_p5 }
  0x35   :  { %2375 = shalt.err (!%p2372_p9)
}
  0x36   :  { %s2504_s20 = smov 64   ;;  %s2505_s24 = smov 4  }
  0x37   :  { %87 = dma.hbm_to_vmem [thread:$0]  %s2757_s5, 1024, %s82_s11, [#allocation12], %s2504_s20, %s2504_s20, %s2505_s24  }
  0x38   :  { %s2376_s1 = scalar_lea.hbm %s2752_s0, 128 }
  0x39   :  { %p2377_p10 = scmp.ne.s32.totalorder %s2752_s0, %s2376_s1  ;;  %p2380_p11 = scmp.lt.u32.totalorder %s2376_s1, %s2752_s0 }
  0x3b   :  { %p2382_p12 = pnand %p2380_p11, %p2377_p10 }
  0x3d   :  { %2385 = shalt.err (!%p2382_p12)
}
  0x3e   :  { %s2386_s12 = scalar_lea.vmem %s25_s13, 128  ;;  %p2391_p0 = scmp.lt.s32.totalorder %s25_s13, %s25_s13 }
  0x3f   :  { %p2387_p13 = scmp.ne.s32.totalorder %s25_s13, %s2386_s12  ;;  %p2392_p1 = scmp.lt.s32.totalorder %s2386_s12, %s2386_s12 }
  0x41   :  { %p2393_p2 = por %p2392_p1, %p2391_p0 }
  0x43   :  { %p2394_p3 = pnand %p2393_p2, %p2387_p13 }
  0x45   :  { %2397 = shalt.err (!%p2394_p3)
}
  0x46   :  { %27 = dma.hbm_to_vmem [thread:$0]  %s2752_s0, 128, %s25_s13, [#allocation3]  }
  0x47   :  { %s2506_s14 = smov [#allocation7]   ;;  %s2507_s18 = smov [#allocation10]  }
  0x48   :  { %s45_s17 = sshll.u32 %s2506_s14, 4  ;;  %s69_s19 = sshll.u32 %s2507_s18, 4  ;;  %s46_s17 = int_to_ptr.vmem [resolvable:$true] %s45_s17  ;;  %s2612_s19 = int_to_ptr.vmem [resolvable:$true] %s69_s19 }
  0x49   :  { %s2398_s23 = scalar_lea.hbm %s2754_s2, 9216 }
  0x4a   :  { %p2399_p4 = scmp.ne.s32.totalorder %s2754_s2, %s2398_s23  ;;  %p2402_p5 = scmp.lt.u32.totalorder %s2398_s23, %s2754_s2 }
  0x4c   :  { %p2404_p6 = pnand %p2402_p5, %p2399_p4 }
  0x4e   :  { %2407 = shalt.err (!%p2404_p6)
}
  0x4f   :  { %s2408_s0 = scalar_lea.vmem %s46_s17, 9216  ;;  %p2413_p8 = scmp.lt.s32.totalorder %s46_s17, %s46_s17 }
  0x50   :  { %p2409_p7 = scmp.ne.s32.totalorder %s46_s17, %s2408_s0  ;;  %p2414_p9 = scmp.lt.s32.totalorder %s2408_s0, %s2408_s0 }
  0x52   :  { %p2415_p10 = por %p2414_p9, %p2413_p8 }
  0x54   :  { %p2416_p11 = pnand %p2415_p10, %p2409_p7 }
  0x56   :  { %2419 = shalt.err (!%p2416_p11)
}
  0x57   :  { %51 = dma.hbm_to_vmem [thread:$0]  %s2754_s2, 9216, %s46_s17, [#allocation6], %s2497_s15, %s2497_s15, %s2498_s16  }
  0x58   :  { %s2420_s30 = scalar_lea.hbm %s2756_s4, 2048 }
  0x59   :  { %p2421_p12 = scmp.ne.s32.totalorder %s2756_s4, %s2420_s30  ;;  %p2424_p13 = scmp.lt.u32.totalorder %s2420_s30, %s2756_s4 }
  0x5b   :  { %p2426_p0 = pnand %p2424_p13, %p2421_p12 }
  0x5d   :  { %2429 = shalt.err (!%p2426_p0)
}
  0x5e   :  { %s2430_s11 = scalar_lea.vmem %s2612_s19, 2048  ;;  %p2435_p2 = scmp.lt.s32.totalorder %s2612_s19, %s2612_s19 }
  0x5f   :  { %p2431_p1 = scmp.ne.s32.totalorder %s2612_s19, %s2430_s11  ;;  %p2436_p3 = scmp.lt.s32.totalorder %s2430_s11, %s2430_s11 }
  0x61   :  { %p2437_p4 = por %p2436_p3, %p2435_p2 }
  0x63   :  { %p2438_p5 = pnand %p2437_p4, %p2431_p1 }
  0x65   :  { %2441 = shalt.err (!%p2438_p5)
}
  0x66   :  { %75 = dma.hbm_to_vmem [thread:$0]  %s2756_s4, 2048, %s2612_s19, [#allocation9], %s2504_s20, %s2504_s20, %s2505_s24  }
  0x67   :  { %s2508_s16 = smov [#allocation13]   ;;  %s2442_s21 = scalar_lea.hbm %s2758_s6, 1024 }
  0x68   :  { %s93_s14 = sshll.u32 %s2508_s16, 4  ;;  %p2443_p6 = scmp.ne.s32.totalorder %s2758_s6, %s2442_s21  ;;  %s94_s14 = int_to_ptr.vmem [resolvable:$true] %s93_s14 }
  0x69   :  { %p2446_p7 = scmp.lt.u32.totalorder %s2442_s21, %s2758_s6 }
  0x6b   :  { %p2448_p8 = pnand %p2446_p7, %p2443_p6 }
  0x6d   :  { %2451 = shalt.err (!%p2448_p8)
}
  0x6e   :  { %s2452_s26 = scalar_lea.vmem %s94_s14, 1024  ;;  %p2457_p10 = scmp.lt.s32.totalorder %s94_s14, %s94_s14 }
  0x6f   :  { %p2453_p9 = scmp.ne.s32.totalorder %s94_s14, %s2452_s26  ;;  %p2458_p11 = scmp.lt.s32.totalorder %s2452_s26, %s2452_s26 }
  0x71   :  { %p2459_p12 = por %p2458_p11, %p2457_p10 }
  0x73   :  { %p2460_p13 = pnand %p2459_p12, %p2453_p9 }
  0x75   :  { %2463 = shalt.err (!%p2460_p13)
}
  0x76   :  { %99 = dma.hbm_to_vmem [thread:$0]  %s2758_s6, 1024, %s94_s14, [#allocation12], %s2504_s20, %s2504_s20, %s2505_s24  }
  0x77   :  { %2486 = dma.done.wait [#allocation3], 128  }
  0x78   :  { %2487 = vsyncadd [#allocation3], 4294967168 }
  0x79   :  { %2488 = dma.done.wait [#allocation6], 9984  }
  0x7a   :  { %2489 = vsyncadd [#allocation6], 4294957312 }
  0x7b   :  { %2490 = dma.done.wait [#allocation9], 8192  }
  0x7c   :  { %2491 = vsyncadd [#allocation9], 4294959104 }
  0x7d   :  { %2492 = dma.done.wait [#allocation12], 2048  }
  0x7e   :  { %2493 = vsyncadd [#allocation12], 4294965248  ;;  %v2509_v0 = vmov 0   ;;  %v2080_v1 = vld [vmem:[#allocation5 + $0x4] ss:$12 sps:$4 sm:$0xff]   ;;  %v124_v5 = vld [vmem:[#allocation2] sm:$0xff]  ;;  %v136_v59 = vlaneseq }
  0x7f   :  { %219 = vmatprep.mubr.bf16.mxu1 %v2509_v0  ;;  %v2082_v2 = vld [vmem:[#allocation5] ss:$12 sps:$4 sm:$0xff]   ;;  %187 = vmatprep.subr.bf16.mxu1 %v2080_v1  ;;  %v2083_v3 = vld [vmem:[#allocation5 + $0x1c] ss:$12 sps:$4 sm:$0xff]   ;;  %v2085_v4 = vld [vmem:[#allocation5 + $0x18] ss:$12 sps:$4 sm:$0xff]   ;;  %v126_v7 = vpack.c.bf16 %v124_v5, %v124_v5 }
  0x80   :  { %188 = vmatpush1.bf16.msra.mxu1 %v2082_v2  ;;  %v2088_v6 = vld [vmem:[#allocation7 + $0x4] ss:$12 sps:$4 sm:$0xff]   ;;  %v2090_v8 = vld [vmem:[#allocation7] ss:$12 sps:$4 sm:$0xff]   ;;  %vm183_vm0 = vcmask 261120   ;;  %v2510_v11 = vmov 0.0  }
  0x81   :  { %189 = vmatprep.subr.bf16.mxu1 %v2083_v3  ;;  %v2086_v9 = vld [vmem:[#allocation5 + $0x8] ss:$12 sps:$4 sm:$0xff]   ;;  %771 = vmatprep.subr.bf16.mxu0 %v2088_v6  ;;  %v2091_v10 = vld [vmem:[#allocation7 + $0x1c] ss:$12 sps:$4 sm:$0xff]   ;;  %v2094_v13 = vld [vmem:[#allocation7 + $0x34] ss:$12 sps:$4 sm:$0xff]  }
  0x82   :  { %772 = vmatpush1.bf16.msra.mxu0 %v2090_v8  ;;  %v2093_v12 = vld [vmem:[#allocation7 + $0x18] ss:$12 sps:$4 sm:$0xff]   ;;  %v2087_v14 = vld [vmem:[#allocation5 + $0x20] ss:$12 sps:$4 sm:$0xff]   ;;  %vm2511_vm1 = vmmov 0   ;;  %v2672_v60 = vshrl.u32 %v136_v59, 7 }
  0x83   :  { %773 = vmatprep.subr.bf16.mxu0 %v2091_v10  ;;  %v2096_v15 = vld [vmem:[#allocation7 + $0x30] ss:$12 sps:$4 sm:$0xff]   ;;  %v2097_v16 = vld [vmem:[#allocation7 + $0x4c] ss:$12 sps:$4 sm:$0xff]   ;;  %v2099_v17 = vld [vmem:[#allocation7 + $0x48] ss:$12 sps:$4 sm:$0xff]  }
  0x84   :  { %190 = vmatpush1.bf16.msra.mxu1 %v2085_v4  ;;  %v2100_v18 = vld [vmem:[#allocation7 + $0x64] ss:$12 sps:$4 sm:$0xff]   ;;  %v2114_v19 = vld [vmem:[#allocation7 + $0xc8] ss:$12 sps:$4 sm:$0xff]   ;;  %v2102_v21 = vld [vmem:[#allocation7 + $0x60] ss:$12 sps:$4 sm:$0xff]  }
  0x85   :  { %1983 = vmatprep.subr.bf16.mxu1 %v2510_v11  ;;  %v2116_v20 = vld [vmem:[#allocation7 + $0x8] ss:$12 sps:$4 sm:$0xff]   ;;  %v2119_v22 = vld [vmem:[#allocation7 + $0xe0] ss:$12 sps:$4 sm:$0xff]   ;;  %v2105_v25 = vld [vmem:[#allocation7 + $0x78] ss:$12 sps:$4 sm:$0xff]  }
  0x86   :  { %774 = vmatpush1.bf16.msra.mxu0 %v2093_v12  ;;  %v2103_v23 = vld [vmem:[#allocation7 + $0x7c] ss:$12 sps:$4 sm:$0xff]   ;;  %v2121_v24 = vld [vmem:[#allocation7 + $0x20] ss:$12 sps:$4 sm:$0xff]   ;;  %v2124_v27 = vld [vmem:[#allocation7 + $0xf8] ss:$12 sps:$4 sm:$0xff]  }
  0x87   :  { %1752 = vmatmul.mubr.msk.bf16.vlgmr.msra.gmra.mrb[0].mxu1 %vm183_vm0, %v126_v7  ;;  %775 = vmatprep.subr.bf16.mxu0 %v2094_v13  ;;  %v2106_v26 = vld [vmem:[#allocation7 + $0x94] ss:$12 sps:$4 sm:$0xff]   ;;  %v2126_v28 = vld [vmem:[#allocation7 + $0x38] ss:$12 sps:$4 sm:$0xff]   ;;  %v2108_v29 = vld [vmem:[#allocation7 + $0x90] ss:$12 sps:$4 sm:$0xff]  }
  0x88   :  { %1984 = vmatpush3.bf16.msra.mxu1 %v2086_v9  ;;  %1987 = vmatprep.mubr.msk.bf16.mxu1 %vm2511_vm1, %v2510_v11  ;;  %v2129_v30 = vld [vmem:[#allocation7 + $0x110] ss:$12 sps:$4 sm:$0xff]   ;;  %v2109_v32 = vld [vmem:[#allocation7 + $0xac] ss:$12 sps:$4 sm:$0xff]   ;;  %v2111_v33 = vld [vmem:[#allocation7 + $0xa8] ss:$12 sps:$4 sm:$0xff]  }
  0x89   :  { %1985 = vmatprep.subr.bf16.mxu1 %v2510_v11  ;;  %v2131_v31 = vld [vmem:[#allocation7 + $0x50] ss:$12 sps:$4 sm:$0xff]   ;;  %v2115_v35 = vld [vmem:[#allocation7 + $0xc0] ss:$12 sps:$4 sm:$0xff]   ;;  %v2120_v37 = vld [vmem:[#allocation7 + $0xd8] ss:$12 sps:$4 sm:$0xff]  }
  0x8a   :  { %776 = vmatpush1.bf16.msra.mxu0 %v2096_v15  ;;  %v2112_v34 = vld [vmem:[#allocation7 + $0xc4] ss:$12 sps:$4 sm:$0xff]   ;;  %v2117_v36 = vld [vmem:[#allocation7 + $0xdc] ss:$12 sps:$4 sm:$0xff]   ;;  %v2122_v38 = vld [vmem:[#allocation7 + $0xf4] ss:$12 sps:$4 sm:$0xff]  }
  0x8b   :  { %777 = vmatprep.subr.bf16.mxu0 %v2097_v16  ;;  %v2125_v39 = vld [vmem:[#allocation7 + $0xf0] ss:$12 sps:$4 sm:$0xff]   ;;  %v2127_v40 = vld [vmem:[#allocation7 + $0x10c] ss:$12 sps:$4 sm:$0xff]   ;;  %v2130_v41 = vld [vmem:[#allocation7 + $0x108] ss:$12 sps:$4 sm:$0xff]  }
  0x8c   :  { %1986 = vmatpush3.bf16.msra.mxu1 %v2087_v14  ;;  %v2132_v42 = vld [vmem:[#allocation7 + $0x124] ss:$12 sps:$4 sm:$0xff]   ;;  %v2134_v43 = vld [vmem:[#allocation7 + $0x128] ss:$12 sps:$4 sm:$0xff]   ;;  %v2135_v44 = vld [vmem:[#allocation7 + $0x120] ss:$12 sps:$4 sm:$0xff]  }
  0x8d   :  { %1912 = vmatprep.subr.bf16.mxu1 %v2114_v19  ;;  %v2136_v45 = vld [vmem:[#allocation7 + $0x68] ss:$12 sps:$4 sm:$0xff]   ;;  %v2139_v47 = vld [vmem:[#allocation7 + $0x140] ss:$12 sps:$4 sm:$0xff]   ;;  %v2140_v48 = vld [vmem:[#allocation7 + $0x138] ss:$12 sps:$4 sm:$0xff]  }
  0x8e   :  { %778 = vmatpush1.bf16.msra.mxu0 %v2099_v17  ;;  %v2137_v46 = vld [vmem:[#allocation7 + $0x13c] ss:$12 sps:$4 sm:$0xff]   ;;  %v2141_v49 = vld [vmem:[#allocation7 + $0x80] ss:$12 sps:$4 sm:$0xff]   ;;  %v2144_v51 = vld [vmem:[#allocation7 + $0x158] ss:$12 sps:$4 sm:$0xff]  }
  0x8f   :  { %1988 = vmatmul.mubr.msk.bf16.vlgmr.msra.gmra.mrb[4].mxu1 %vm183_vm0, %v126_v7  ;;  %779 = vmatprep.subr.bf16.mxu0 %v2100_v18  ;;  %v2142_v50 = vld [vmem:[#allocation7 + $0x154] ss:$12 sps:$4 sm:$0xff]   ;;  %v2145_v52 = vld [vmem:[#allocation7 + $0x150] ss:$12 sps:$4 sm:$0xff]   ;;  %v2146_v53 = vld [vmem:[#allocation7 + $0x98] ss:$12 sps:$4 sm:$0xff]  }
  0x90   :  { %1913 = vmatpush3.bf16.msra.mxu1 %v2116_v20  ;;  %v2147_v54 = vld [vmem:[#allocation7 + $0x16c] ss:$12 sps:$4 sm:$0xff]   ;;  %v2149_v55 = vld [vmem:[#allocation7 + $0x170] ss:$12 sps:$4 sm:$0xff]   ;;  %v2150_v56 = vld [vmem:[#allocation7 + $0x168] ss:$12 sps:$4 sm:$0xff]  }
  0x91   :  { %1914 = vmatprep.subr.bf16.mxu1 %v2119_v22  ;;  %v2151_v57 = vld [vmem:[#allocation7 + $0xb0] ss:$12 sps:$4 sm:$0xff]   ;;  %v2675_v61 = vsub.s32 0, %v2672_v60  ;;  %v125_v62 = vld [vmem:[%s2759_s7] sm:$0x7]  ;;  %v2681_v63 = vsub.s32 1, %v2672_v60 }
  0x92   :  { %780 = vmatpush1.bf16.msra.mxu0 %v2102_v21  ;;  %v2154_v58 = vld [vmem:[#allocation7 + $0x184] ss:$12 sps:$4 sm:$0xff]   ;;  %v2152_v17 = vld [vmem:[#allocation7 + $0x180] ss:$12 sps:$4 sm:$0xff]   ;;  %v2155_v18 = vld [vmem:[#allocation7 + $0x188] ss:$12 sps:$4 sm:$0xff]  }
  0x93   :  { %781 = vmatprep.subr.bf16.mxu0 %v2103_v23  ;;  %v139_v1 = vrot.slane %v125_v62, %v2675_v61  ;;  %v143_v2 = vrot.slane %v125_v62, %v2681_v63  ;;  %v2158_v20 = vld [vmem:[#allocation7 + $0x19c] ss:$12 sps:$4 sm:$0xff]   ;;  %v2156_v21 = vld [vmem:[#allocation7 + $0x198] ss:$12 sps:$4 sm:$0xff]   ;;  %v2159_v22 = vld [vmem:[#allocation7 + $0x1a0] ss:$12 sps:$4 sm:$0xff]  }
  0x94   :  { %1915 = vmatpush3.bf16.msra.mxu1 %v2121_v24  ;;  %v2162_v23 = vld [vmem:[#allocation7 + $0x1b4] ss:$12 sps:$4 sm:$0xff]   ;;  %v146_v24 = vsub.s32 2, %v2672_v60  ;;  %s2512_s12 = smov [#allocation14]  }
  0x95   :  { %1916 = vmatprep.subr.bf16.mxu1 %v2124_v27  ;;  %v2166_v27 = vld [vmem:[#allocation7 + $0x1cc] ss:$12 sps:$4 sm:$0xff]   ;;  %v2202_v59 = vld [vmem:[#allocation8 + $0x60] ss:$8 sps:$4 sm:$0xff]   ;;  %s1734_s5 = sshll.u32 %s2512_s12, 4  ;;  %s1735_s5 = int_to_ptr.vmem [resolvable:$true] %s1734_s5 }
  0x96   :  { %782 = vmatpush1.bf16.msra.mxu0 %v2105_v25  ;;  %v2160_v25 = vld [vmem:[#allocation7 + $0x1b0] ss:$12 sps:$4 sm:$0xff]   ;;  %s2464_s11 = scalar_lea.vmem %s1735_s5, 128  ;;  %p2469_p1 = scmp.lt.s32.totalorder %s1735_s5, %s1735_s5 }
  0x97   :  { %783 = vmatprep.subr.bf16.mxu0 %v2106_v26  ;;  %v2163_v26 = vld [vmem:[#allocation7 + $0x1b8] ss:$12 sps:$4 sm:$0xff]   ;;  %p2465_p0 = scmp.ne.s32.totalorder %s1735_s5, %s2464_s11  ;;  %p2470_p2 = scmp.lt.s32.totalorder %s2464_s11, %s2464_s11 }
  0x98   :  { %1917 = vmatpush3.bf16.msra.mxu1 %v2126_v28  ;;  %v147_v28 = vrot.slane %v125_v62, %v146_v24  ;;  %v2207_v62 = vld [vmem:[#allocation8 + $0x74] ss:$8 sps:$4 sm:$0xff]  }
  0x99   :  { %1918 = vmatprep.subr.bf16.mxu1 %v2129_v30  ;;  %v2167_v30 = vld [vmem:[#allocation7 + $0x1d0] ss:$12 sps:$4 sm:$0xff]   ;;  %p2471_p3 = por %p2470_p2, %p2469_p1 }
  0x9a   :  { %784 = vmatpush1.bf16.msra.mxu0 %v2108_v29  ;;  %v2164_v29 = vld [vmem:[#allocation7 + $0x1c8] ss:$12 sps:$4 sm:$0xff]  }
  0x9b   :  { %785 = vmatprep.subr.bf16.mxu0 %v2109_v32  ;;  %p2472_p4 = pnand %p2471_p3, %p2465_p0 }
  0x9c   :  { %1919 = vmatpush3.bf16.msra.mxu1 %v2131_v31  ;;  %v2170_v31 = vld [vmem:[#allocation7 + $0x1e4] ss:$12 sps:$4 sm:$0xff]  }
  0x9d   :  { %1920 = vmatprep.subr.bf16.mxu1 %v2134_v43  ;;  %v2180_v43 = vld [vmem:[#allocation7 + $0x228] ss:$12 sps:$4 sm:$0xff]  }
  0x9e   :  { %786 = vmatpush1.bf16.msra.mxu0 %v2111_v33  ;;  %v2168_v33 = vld [vmem:[#allocation7 + $0x1e0] ss:$12 sps:$4 sm:$0xff]  }
  0x9f   :  { %787 = vmatprep.subr.bf16.mxu0 %v2112_v34  ;;  %v2171_v34 = vld [vmem:[#allocation7 + $0x1e8] ss:$12 sps:$4 sm:$0xff]  }
  0xa0   :  { %1921 = vmatpush3.bf16.msra.mxu1 %v2136_v45  ;;  %v2186_v45 = vld [vmem:[#allocation8 + $0x4] ss:$8 sps:$4 sm:$0xff]  }
  0xa1   :  { %1922 = vmatprep.subr.bf16.mxu1 %v2139_v47  ;;  %v2184_v47 = vld [vmem:[#allocation8] ss:$8 sps:$4 sm:$0xff]  }
  0xa2   :  { %788 = vmatpush1.bf16.msra.mxu0 %v2115_v35  ;;  %v2174_v35 = vld [vmem:[#allocation7 + $0x1fc] ss:$12 sps:$4 sm:$0xff]  }
  0xa3   :  { %789 = vmatprep.subr.bf16.mxu0 %v2117_v36  ;;  %v2172_v36 = vld [vmem:[#allocation7 + $0x1f8] ss:$12 sps:$4 sm:$0xff]  }
  0xa4   :  { %1923 = vmatpush3.bf16.msra.mxu1 %v2141_v49  ;;  %v2187_v49 = vld [vmem:[#allocation8 + $0x10] ss:$8 sps:$4 sm:$0xff]  }
  0xa5   :  { %1924 = vmatprep.subr.bf16.mxu1 %v2144_v51  ;;  %v2190_v51 = vld [vmem:[#allocation8 + $0x20] ss:$8 sps:$4 sm:$0xff]  }
  0xa6   :  { %790 = vmatpush1.bf16.msra.mxu0 %v2120_v37  ;;  %v2175_v37 = vld [vmem:[#allocation7 + $0x200] ss:$12 sps:$4 sm:$0xff]  }
  0xa7   :  { %791 = vmatprep.subr.bf16.mxu0 %v2122_v38  ;;  %v2178_v38 = vld [vmem:[#allocation7 + $0x214] ss:$12 sps:$4 sm:$0xff]  }
  0xa8   :  { %1925 = vmatpush3.bf16.msra.mxu1 %v2146_v53  ;;  %v2193_v53 = vld [vmem:[#allocation8 + $0x30] ss:$8 sps:$4 sm:$0xff]  }
  0xa9   :  { %1926 = vmatprep.subr.bf16.mxu1 %v2149_v55  ;;  %v2196_v55 = vld [vmem:[#allocation8 + $0x40] ss:$8 sps:$4 sm:$0xff]  }
  0xaa   :  { %792 = vmatpush1.bf16.msra.mxu0 %v2125_v39  ;;  %v2176_v39 = vld [vmem:[#allocation7 + $0x210] ss:$12 sps:$4 sm:$0xff]  }
  0xab   :  { %793 = vmatprep.subr.bf16.mxu0 %v2127_v40  ;;  %v2179_v40 = vld [vmem:[#allocation7 + $0x218] ss:$12 sps:$4 sm:$0xff]  }
  0xac   :  { %1927 = vmatpush3.bf16.msra.mxu1 %v2151_v57  ;;  %v2201_v57 = vld [vmem:[#allocation8 + $0x54] ss:$8 sps:$4 sm:$0xff]  }
  0xad   :  { %1991 = vmatprep.subr.bf16.mxu1 %v2510_v11 }
  0xae   :  { %794 = vmatpush1.bf16.msra.mxu0 %v2130_v41  ;;  %v2182_v41 = vld [vmem:[#allocation7 + $0x22c] ss:$12 sps:$4 sm:$0xff]  }
  0xaf   :  { %795 = vmatprep.subr.bf16.mxu0 %v2132_v42 }
  0xb2   :  { %796 = vmatpush1.bf16.msra.mxu0 %v2135_v44  ;;  %v2183_v44 = vld [vmem:[#allocation7 + $0x230] ss:$12 sps:$4 sm:$0xff]  }
  0xb3   :  { %797 = vmatprep.subr.bf16.mxu0 %v2137_v46 }
  0xb6   :  { %798 = vmatpush1.bf16.msra.mxu0 %v2140_v48  ;;  %v2189_v48 = vld [vmem:[#allocation8 + $0x14] ss:$8 sps:$4 sm:$0xff]  }
  0xb7   :  { %799 = vmatprep.subr.bf16.mxu0 %v2142_v50  ;;  %v2192_v50 = vld [vmem:[#allocation8 + $0x24] ss:$8 sps:$4 sm:$0xff]  }
  0xba   :  { %800 = vmatpush1.bf16.msra.mxu0 %v2145_v52  ;;  %v2195_v52 = vld [vmem:[#allocation8 + $0x34] ss:$8 sps:$4 sm:$0xff]  }
  0xbb   :  { %801 = vmatprep.subr.bf16.mxu0 %v2147_v54  ;;  %v2198_v54 = vld [vmem:[#allocation8 + $0x44] ss:$8 sps:$4 sm:$0xff]  }
  0xbe   :  { %802 = vmatpush1.bf16.msra.mxu0 %v2150_v56  ;;  %v2199_v56 = vld [vmem:[#allocation8 + $0x50] ss:$8 sps:$4 sm:$0xff]  }
  0xbf   :  { %812 = vmatprep.subr.bf16.mxu0 %v2154_v58  ;;  %v2204_v58 = vld [vmem:[#allocation8 + $0x64] ss:$8 sps:$4 sm:$0xff]  }
 0x15a   :  { %v221_v3 = vpop.f32.mrb[0].mxu1 }
 0x15b   :  { %v222_v4 = vadd.f32 %v221_v3, %v139_v1  ;;  %v223_v5 = vpop.f32.mrb[1].mxu1  ;;  %v2205_v1 = vld [vmem:[#allocation8 + $0x70] ss:$8 sps:$4 sm:$0xff]   ;;  %v2208_v3 = vld [vmem:[#allocation8 + $0x80] ss:$8 sps:$4 sm:$0xff]  }
 0x15c   :  { %v224_v6 = vadd.f32 %v223_v5, %v143_v2  ;;  %v225_v7 = vpop.f32.mrb[2].mxu1  ;;  %v2210_v2 = vld [vmem:[#allocation8 + $0x84] ss:$8 sps:$4 sm:$0xff]   ;;  %v2211_v5 = vld [vmem:[#allocation8 + $0x90] ss:$8 sps:$4 sm:$0xff]  }
 0x15d   :  { %2288 = vtanh.f32 %v222_v4  ;;  %v226_v8 = vpop.f32.mrb[3].mxu1  ;;  %v2213_v4 = vld [vmem:[#allocation8 + $0x94] ss:$8 sps:$4 sm:$0xff]   ;;  %v2214_v7 = vld [vmem:[#allocation8 + $0xa0] ss:$8 sps:$4 sm:$0xff]  }
 0x15e   :  { %2290 = vtanh.f32 %v224_v6  ;;  %v2216_v6 = vld [vmem:[#allocation8 + $0xa4] ss:$8 sps:$4 sm:$0xff]   ;;  %v2219_v8 = vld [vmem:[#allocation8 + $0xb4] ss:$8 sps:$4 sm:$0xff]  }
 0x162   :  { %v262_v9 = vpop.f32.mrb[4].mxu1 }
 0x163   :  { %v1989_v10 = vpop.f32.mrb[5].mxu1  ;;  %v263_v32 = vadd.f32 %v262_v9, %v147_v28  ;;  %v2217_v9 = vld [vmem:[#allocation8 + $0xb0] ss:$8 sps:$4 sm:$0xff]  }
 0x164   :  { %v265_v12 = vpop.f32.mrb[6].mxu1  ;;  %v2222_v10 = vld [vmem:[#allocation8 + $0xc4] ss:$8 sps:$4 sm:$0xff]   ;;  %v2263_v28 = vld [vmem:[#allocation10 + $0x18] sm:$0xff]  }
 0x165   :  { %v1990_v13 = vpop.f32.mrb[7].mxu1  ;;  %2292 = vtanh.f32 %v263_v32  ;;  %v2220_v12 = vld [vmem:[#allocation8 + $0xc0] ss:$8 sps:$4 sm:$0xff]  }
 0x166   :  { %v2225_v13 = vld [vmem:[#allocation8 + $0xd4] ss:$8 sps:$4 sm:$0xff]  }
 0x167   :  { %v2289_v14 = vpop.eup %2288 }
 0x168   :  { %v2291_v15 = vpop.eup %2290  ;;  %v272_v19 = vpack.c.bf16 %v2289_v14, %v2289_v14  ;;  %v2223_v14 = vld [vmem:[#allocation8 + $0xd0] ss:$8 sps:$4 sm:$0xff]  }
 0x169   :  { %v273_v16 = vpack.c.bf16 %v2291_v15, %v2291_v15  ;;  %v2228_v15 = vld [vmem:[#allocation8 + $0xe4] ss:$8 sps:$4 sm:$0xff]  }
 0x16b   :  { %803 = vmatprep.mubr.bf16.mxu0 %v273_v16  ;;  %885 = vmatprep.mubr.bf16.mxu1 %v273_v16  ;;  %v2226_v16 = vld [vmem:[#allocation8 + $0xe0] ss:$8 sps:$4 sm:$0xff]  }
 0x16c   :  { %804 = vmatmul.mubr.bf16.vlgmr.msra.gmra.mrb[0].mxu0 %v272_v19  ;;  %886 = vmatmul.mubr.bf16.vlgmr.msra.gmra.mrb[8].mxu1 %v272_v19  ;;  %v2234_v19 = vld [vmem:[#allocation8 + $0x104] ss:$8 sps:$4 sm:$0xff]  }
 0x16d   :  { %813 = vmatpush1.bf16.msra.mxu0 %v2152_v17  ;;  %1992 = vmatpush3.bf16.msra.mxu1 %v2155_v18  ;;  %v2231_v17 = vld [vmem:[#allocation8 + $0xf4] ss:$8 sps:$4 sm:$0xff]   ;;  %v2229_v18 = vld [vmem:[#allocation8 + $0xf0] ss:$8 sps:$4 sm:$0xff]  }
 0x16e   :  { %814 = vmatprep.subr.bf16.mxu0 %v2158_v20  ;;  %1993 = vmatprep.subr.bf16.mxu1 %v2510_v11  ;;  %v2256_v20 = vld [vmem:[#allocation10 + $0x40] sm:$0xff]  }
 0x16f   :  { %844 = vmatprep.mubr.bf16.mxu0 %v2509_v0  ;;  %2007 = vmatprep.mubr.msk.bf16.mxu1 %vm2511_vm1, %v2510_v11  ;;  %v2293_v42 = vpop.eup %2292 }
 0x170   :  { %v274_v46 = vpack.c.bf16 %v2293_v42, %v2293_v42 }
 0x171   :  { %815 = vmatpush1.bf16.msra.mxu0 %v2156_v21  ;;  %1994 = vmatpush3.bf16.msra.mxu1 %v2159_v22  ;;  %v2257_v21 = vld [vmem:[#allocation10] sm:$0xff]   ;;  %v2258_v22 = vld [vmem:[#allocation10 + $0x48] sm:$0xff]  }
 0x172   :  { %816 = vmatprep.subr.bf16.mxu0 %v2162_v23  ;;  %1995 = vmatprep.subr.bf16.mxu1 %v2510_v11  ;;  %v2259_v23 = vld [vmem:[#allocation10 + $0x8] sm:$0xff]  }
 0x175   :  { %817 = vmatpush1.bf16.msra.mxu0 %v2160_v25  ;;  %1996 = vmatpush3.bf16.msra.mxu1 %v2163_v26  ;;  %v2260_v25 = vld [vmem:[#allocation10 + $0x50] sm:$0xff]  }
 0x176   :  { %818 = vmatprep.subr.bf16.mxu0 %v2166_v27  ;;  %1997 = vmatprep.subr.bf16.mxu1 %v2510_v11  ;;  %v2261_v26 = vld [vmem:[#allocation10 + $0x10] sm:$0xff]   ;;  %v2262_v27 = vld [vmem:[#allocation10 + $0x58] sm:$0xff]  }
 0x179   :  { %819 = vmatpush1.bf16.msra.mxu0 %v2164_v29  ;;  %1998 = vmatpush3.bf16.msra.mxu1 %v2167_v30 }
 0x17a   :  { %820 = vmatprep.subr.bf16.mxu0 %v2170_v31  ;;  %1999 = vmatprep.subr.bf16.mxu1 %v2510_v11 }
 0x17d   :  { %821 = vmatpush1.bf16.msra.mxu0 %v2168_v33  ;;  %2000 = vmatpush3.bf16.msra.mxu1 %v2171_v34  ;;  %v271_v34 = vld [vmem:[%s2759_s7 + $0x3] sm:$0x7] }
 0x17e   :  { %822 = vmatprep.subr.bf16.mxu0 %v2174_v35  ;;  %2001 = vmatprep.subr.bf16.mxu1 %v2510_v11  ;;  %v383_v35 = vrot.slane %v271_v34, %v146_v24 }
 0x181   :  { %823 = vmatpush1.bf16.msra.mxu0 %v2172_v36  ;;  %2002 = vmatpush3.bf16.msra.mxu1 %v2175_v37  ;;  %v375_v36 = vrot.slane %v271_v34, %v2675_v61  ;;  %v379_v37 = vrot.slane %v271_v34, %v2681_v63  ;;  %v2277_v34 = vld [vmem:[#allocation11 + $0x28] sm:$0xff]  }
 0x182   :  { %824 = vmatprep.subr.bf16.mxu0 %v2178_v38  ;;  %2003 = vmatprep.subr.bf16.mxu1 %v2510_v11 }
 0x185   :  { %825 = vmatpush1.bf16.msra.mxu0 %v2176_v39  ;;  %2004 = vmatpush3.bf16.msra.mxu1 %v2179_v40 }
 0x186   :  { %826 = vmatprep.subr.bf16.mxu0 %v2182_v41  ;;  %2005 = vmatprep.subr.bf16.mxu1 %v2510_v11 }
 0x189   :  { %827 = vmatpush1.bf16.msra.mxu0 %v2180_v43  ;;  %2006 = vmatpush3.bf16.msra.mxu1 %v2183_v44 }
 0x18a   :  { %1239 = vmatprep.subr.bf16.mxu1 %v2186_v45  ;;  %1943 = vmatprep.subr.bf16.mxu0 %v2256_v20 }
 0x18c   :  { %845 = vmatmul.mubr.bf16.vlgmr.msra.gmra.mrb[0].mxu0 %v274_v46  ;;  %2008 = vmatmul.mubr.bf16.vlgmr.msra.gmra.mrb[12].mxu1 %v274_v46 }
 0x18d   :  { %1240 = vmatpush1.bf16.msra.mxu1 %v2184_v47  ;;  %1944 = vmatpush3.bf16.msra.mxu0 %v2257_v21 }
 0x18e   :  { %1241 = vmatprep.subr.bf16.mxu1 %v2189_v48  ;;  %1945 = vmatprep.subr.bf16.mxu0 %v2258_v22 }
 0x191   :  { %1242 = vmatpush1.bf16.msra.mxu1 %v2187_v49  ;;  %1946 = vmatpush3.bf16.msra.mxu0 %v2259_v23 }
 0x192   :  { %1243 = vmatprep.subr.bf16.mxu1 %v2192_v50  ;;  %1947 = vmatprep.subr.bf16.mxu0 %v2260_v25 }
 0x195   :  { %1244 = vmatpush1.bf16.msra.mxu1 %v2190_v51  ;;  %1948 = vmatpush3.bf16.msra.mxu0 %v2261_v26  ;;  %v2232_v51 = vld [vmem:[#allocation8 + $0x100] ss:$8 sps:$4 sm:$0xff]  }
 0x196   :  { %1245 = vmatprep.subr.bf16.mxu1 %v2195_v52  ;;  %1949 = vmatprep.subr.bf16.mxu0 %v2262_v27 }
 0x199   :  { %1246 = vmatpush1.bf16.msra.mxu1 %v2193_v53  ;;  %1950 = vmatpush3.bf16.msra.mxu0 %v2263_v28  ;;  %v2237_v53 = vld [vmem:[#allocation8 + $0x114] ss:$8 sps:$4 sm:$0xff]  }
 0x19a   :  { %1247 = vmatprep.subr.bf16.mxu1 %v2198_v54  ;;  %v2235_v54 = vld [vmem:[#allocation8 + $0x110] ss:$8 sps:$4 sm:$0xff]  }
 0x19d   :  { %1248 = vmatpush1.bf16.msra.mxu1 %v2196_v55  ;;  %v2240_v55 = vld [vmem:[#allocation8 + $0x124] ss:$8 sps:$4 sm:$0xff]  }
 0x19e   :  { %1249 = vmatprep.subr.bf16.mxu1 %v2201_v57  ;;  %v2243_v57 = vld [vmem:[#allocation8 + $0x134] ss:$8 sps:$4 sm:$0xff]  }
 0x1a1   :  { %1250 = vmatpush1.bf16.msra.mxu1 %v2199_v56  ;;  %v2238_v56 = vld [vmem:[#allocation8 + $0x120] ss:$8 sps:$4 sm:$0xff]  }
 0x1a2   :  { %1251 = vmatprep.subr.bf16.mxu1 %v2204_v58  ;;  %v2241_v58 = vld [vmem:[#allocation8 + $0x130] ss:$8 sps:$4 sm:$0xff]  }
 0x1a5   :  { %1252 = vmatpush1.bf16.msra.mxu1 %v2202_v59  ;;  %v2246_v59 = vld [vmem:[#allocation8 + $0x144] ss:$8 sps:$4 sm:$0xff]  }
 0x1a6   :  { %1253 = vmatprep.subr.bf16.mxu1 %v2207_v62  ;;  %v2244_v62 = vld [vmem:[#allocation8 + $0x140] ss:$8 sps:$4 sm:$0xff]  }
 0x1a9   :  { %1254 = vmatpush1.bf16.msra.mxu1 %v2205_v1  ;;  %v2249_v1 = vld [vmem:[#allocation8 + $0x154] ss:$8 sps:$4 sm:$0xff]  }
 0x1aa   :  { %1255 = vmatprep.subr.bf16.mxu1 %v2210_v2  ;;  %v2247_v2 = vld [vmem:[#allocation8 + $0x150] ss:$8 sps:$4 sm:$0xff]  }
 0x1ad   :  { %1256 = vmatpush1.bf16.msra.mxu1 %v2208_v3  ;;  %v2252_v3 = vld [vmem:[#allocation8 + $0x164] ss:$8 sps:$4 sm:$0xff]  }
 0x1ae   :  { %1257 = vmatprep.subr.bf16.mxu1 %v2213_v4  ;;  %v2255_v4 = vld [vmem:[#allocation8 + $0x174] ss:$8 sps:$4 sm:$0xff]  }
 0x1b1   :  { %1258 = vmatpush1.bf16.msra.mxu1 %v2211_v5  ;;  %v2253_v5 = vld [vmem:[#allocation8 + $0x170] ss:$8 sps:$4 sm:$0xff]  }
 0x1b2   :  { %1259 = vmatprep.subr.bf16.mxu1 %v2216_v6 }
 0x1b5   :  { %1260 = vmatpush1.bf16.msra.mxu1 %v2214_v7 }
 0x1b6   :  { %1261 = vmatprep.subr.bf16.mxu1 %v2219_v8  ;;  %v2264_v8 = vld [vmem:[#allocation10 + $0x60] sm:$0xff]  }
 0x1b7   :  { %1951 = vmatprep.subr.bf16.mxu0 %v2264_v8 }
 0x1b9   :  { %1262 = vmatpush1.bf16.msra.mxu1 %v2217_v9  ;;  %v2265_v9 = vld [vmem:[#allocation10 + $0x20] sm:$0xff]  }
 0x1ba   :  { %1263 = vmatprep.subr.bf16.mxu1 %v2222_v10  ;;  %1952 = vmatpush3.bf16.msra.mxu0 %v2265_v9  ;;  %v2266_v10 = vld [vmem:[#allocation10 + $0x68] sm:$0xff]  }
 0x1bb   :  { %1953 = vmatprep.subr.bf16.mxu0 %v2266_v10 }
 0x1bd   :  { %1264 = vmatpush1.bf16.msra.mxu1 %v2220_v12  ;;  %v2267_v12 = vld [vmem:[#allocation10 + $0x28] sm:$0xff]  }
 0x1be   :  { %1265 = vmatprep.subr.bf16.mxu1 %v2225_v13  ;;  %1954 = vmatpush3.bf16.msra.mxu0 %v2267_v12  ;;  %v2268_v13 = vld [vmem:[#allocation10 + $0x70] sm:$0xff]  }
 0x1bf   :  { %1955 = vmatprep.subr.bf16.mxu0 %v2268_v13 }
 0x1c1   :  { %1266 = vmatpush1.bf16.msra.mxu1 %v2223_v14  ;;  %v2269_v14 = vld [vmem:[#allocation10 + $0x30] sm:$0xff]  }
 0x1c2   :  { %1267 = vmatprep.subr.bf16.mxu1 %v2228_v15  ;;  %1956 = vmatpush3.bf16.msra.mxu0 %v2269_v14  ;;  %v2270_v15 = vld [vmem:[#allocation10 + $0x78] sm:$0xff]  }
 0x1c3   :  { %1957 = vmatprep.subr.bf16.mxu0 %v2270_v15 }
 0x1c5   :  { %1268 = vmatpush1.bf16.msra.mxu1 %v2226_v16  ;;  %v2271_v16 = vld [vmem:[#allocation10 + $0x38] sm:$0xff]  }
 0x1c6   :  { %1269 = vmatprep.subr.bf16.mxu1 %v2231_v17  ;;  %1958 = vmatpush3.bf16.msra.mxu0 %v2271_v16  ;;  %v936_v17 = vld [vmem:[%s2759_s7 + $0x6] sm:$0x3] }
 0x1c7   :  { %2011 = vmatprep.subr.bf16.mxu0 %v2510_v11 }
 0x1c9   :  { %1270 = vmatpush1.bf16.msra.mxu1 %v2229_v18  ;;  %v992_v18 = vrot.slane %v936_v17, %v2675_v61  ;;  %v2274_v61 = vld [vmem:[#allocation11 + $0x10] sm:$0xff]  }
 0x1ca   :  { %1280 = vmatprep.subr.bf16.mxu1 %v2234_v19  ;;  %v996_v19 = vrot.slane %v936_v17, %v2681_v63  ;;  %v2275_v63 = vld [vmem:[#allocation11 + $0x18] sm:$0xff]  }
 0x23f   :  { %v1928_v29 = vpop.f32.mrb[8].mxu1 }
 0x240   :  { %v1929_v30 = vpop.f32.mrb[9].mxu1 }
 0x241   :  { %v1930_v31 = vadd.f32 %v1929_v30, %v1928_v29  ;;  %v1931_v32 = vpop.f32.mrb[10].mxu1  ;;  %v2272_v30 = vld [vmem:[#allocation11] sm:$0xff]  }
 0x242   :  { %v1932_v33 = vpop.f32.mrb[11].mxu1  ;;  %v2273_v32 = vld [vmem:[#allocation11 + $0x8] sm:$0xff]  }
 0x243   :  { %v888_v38 = vadd.f32 %v1930_v31, %v383_v35  ;;  %v2276_v33 = vld [vmem:[#allocation11 + $0x20] sm:$0xff]   ;;  %v2278_v35 = vld [vmem:[#allocation11 + $0x30] sm:$0xff]  }
 0x25f   :  { %v846_v39 = vpop.f32.mrb[0].mxu0  ;;  %v927_v40 = vpop.f32.mrb[12].mxu1 }
 0x260   :  { %v2051_v41 = vadd.f32 %v846_v39, %v375_v36  ;;  %v928_v42 = vadd.f32 %v927_v40, %v888_v38  ;;  %v848_v43 = vpop.f32.mrb[1].mxu0  ;;  %v2009_v44 = vpop.f32.mrb[13].mxu1  ;;  %v2279_v36 = vld [vmem:[#allocation11 + $0x38] sm:$0xff]   ;;  %v1874_v38 = vld [vmem:[%s2759_s7 + $0x8] ss:$0 sm:$0xff] }
 0x261   :  { %v2052_v45 = vadd.f32 %v848_v43, %v379_v37  ;;  %v850_v46 = vpop.f32.mrb[2].mxu0  ;;  %v930_v47 = vpop.f32.mrb[14].mxu1 }
 0x262   :  { %v851_v48 = vpop.f32.mrb[3].mxu0  ;;  %v2010_v49 = vpop.f32.mrb[15].mxu1  ;;  %2294 = vtanh.f32 %v2051_v41  ;;  %v2281_v47 = vld [vmem:[#allocation13 + $0x8] sm:$0xff]  }
 0x263   :  { %2296 = vtanh.f32 %v2052_v45  ;;  %v2280_v45 = vld [vmem:[#allocation13] sm:$0xff]   ;;  %v2282_v48 = vld [vmem:[#allocation13 + $0x10] sm:$0xff]   ;;  %v2283_v49 = vld [vmem:[#allocation13 + $0x18] sm:$0xff]  }
 0x264   :  { %2298 = vtanh.f32 %v928_v42 }
 0x26c   :  { %v2295_v60 = vpop.eup %2294 }
 0x26d   :  { %v2297_v24 = vpop.eup %2296  ;;  %v937_v52 = vpack.c.bf16 %v2295_v60, %v2295_v60  ;;  %v2284_v60 = vld [vmem:[#allocation13 + $0x20] sm:$0xff]  }
 0x26e   :  { %v938_v50 = vpack.c.bf16 %v2297_v24, %v2297_v24  ;;  %v2299_v6 = vpop.eup %2298  ;;  %v2285_v24 = vld [vmem:[#allocation13 + $0x28] sm:$0xff]  }
 0x26f   :  { %v939_v7 = vpack.c.bf16 %v2299_v6, %v2299_v6 }
 0x270   :  { %1271 = vmatprep.mubr.bf16.mxu1 %v938_v50  ;;  %v2286_v50 = vld [vmem:[#allocation13 + $0x30] sm:$0xff]  }
 0x271   :  { %1272 = vmatmul.mubr.bf16.vlgmr.msra.gmra.mrb[16].mxu1 %v937_v52  ;;  %v1891_v52 = vld [vmem:[%s2759_s7 + $0x9] ss:$0 sm:$0xff] }
 0x272   :  { %1281 = vmatpush1.bf16.msra.mxu1 %v2232_v51  ;;  %1312 = vmatprep.mubr.bf16.mxu1 %v2509_v0  ;;  %v2250_v0 = vld [vmem:[#allocation8 + $0x160] ss:$8 sps:$4 sm:$0xff]   ;;  %v2287_v51 = vld [vmem:[#allocation13 + $0x38] sm:$0xff]  }
 0x273   :  { %1282 = vmatprep.subr.bf16.mxu1 %v2237_v53 }
 0x276   :  { %1283 = vmatpush1.bf16.msra.mxu1 %v2235_v54 }
 0x277   :  { %1284 = vmatprep.subr.bf16.mxu1 %v2240_v55 }
 0x27a   :  { %1285 = vmatpush1.bf16.msra.mxu1 %v2238_v56 }
 0x27b   :  { %1286 = vmatprep.subr.bf16.mxu1 %v2243_v57 }
 0x27e   :  { %1287 = vmatpush1.bf16.msra.mxu1 %v2241_v58 }
 0x27f   :  { %1288 = vmatprep.subr.bf16.mxu1 %v2246_v59 }
 0x282   :  { %1289 = vmatpush1.bf16.msra.mxu1 %v2244_v62  ;;  %v1900_v62 = vld [vmem:[%s2759_s7 + $0xa] ss:$0 sm:$0xff] }
 0x283   :  { %1290 = vmatprep.subr.bf16.mxu1 %v2249_v1 }
 0x286   :  { %1291 = vmatpush1.bf16.msra.mxu1 %v2247_v2 }
 0x287   :  { %1292 = vmatprep.subr.bf16.mxu1 %v2252_v3 }
 0x28a   :  { %1293 = vmatpush1.bf16.msra.mxu1 %v2250_v0 }
 0x28b   :  { %1294 = vmatprep.subr.bf16.mxu1 %v2255_v4 }
 0x28e   :  { %1295 = vmatpush1.bf16.msra.mxu1 %v2253_v5 }
 0x291   :  { %1313 = vmatmul.mubr.bf16.vlgmr.msra.gmra.mrb[16].mxu1 %v939_v7 }
 0x364   :  { %v1314_v20 = vpop.f32.mrb[16].mxu1 }
 0x365   :  { %v2053_v21 = vadd.f32 %v1314_v20, %v992_v18  ;;  %v1316_v22 = vpop.f32.mrb[17].mxu1 }
 0x366   :  { %v2054_v23 = vadd.f32 %v1316_v22, %v996_v19  ;;  %v1318_v25 = vpop.f32.mrb[18].mxu1 }
 0x367   :  { %2300 = vtanh.f32 %v2053_v21  ;;  %v1319_v26 = vpop.f32.mrb[19].mxu1 }
 0x368   :  { %2302 = vtanh.f32 %v2054_v23 }
 0x371   :  { %v2301_v27 = vpop.eup %2300 }
 0x372   :  { %v2303_v28 = vpop.eup %2302  ;;  %v1324_v31 = vpack.c.bf16 %v2301_v27, %v2301_v27 }
 0x373   :  { %v1325_v29 = vpack.c.bf16 %v2303_v28, %v2303_v28 }
 0x375   :  { %1492 = vmatprep.mubr.bf16.mxu0 %v1325_v29 }
 0x376   :  { %1493 = vmatmul.mubr.bf16.vlgmr.msra.gmra.mrb[4].mxu0 %v1324_v31 }
 0x377   :  { %2012 = vmatpush3.bf16.msra.mxu0 %v2272_v30  ;;  %2027 = vmatprep.mubr.msk.bf16.mxu0 %vm2511_vm1, %v2510_v11 }
 0x378   :  { %2013 = vmatprep.subr.bf16.mxu0 %v2510_v11 }
 0x37b   :  { %2014 = vmatpush3.bf16.msra.mxu0 %v2273_v32 }
 0x37c   :  { %2015 = vmatprep.subr.bf16.mxu0 %v2510_v11 }
 0x37f   :  { %2016 = vmatpush3.bf16.msra.mxu0 %v2274_v61 }
 0x380   :  { %2017 = vmatprep.subr.bf16.mxu0 %v2510_v11 }
 0x383   :  { %2018 = vmatpush3.bf16.msra.mxu0 %v2275_v63 }
 0x384   :  { %2019 = vmatprep.subr.bf16.mxu0 %v2510_v11 }
 0x387   :  { %2020 = vmatpush3.bf16.msra.mxu0 %v2276_v33 }
 0x388   :  { %2021 = vmatprep.subr.bf16.mxu0 %v2510_v11 }
 0x38b   :  { %2022 = vmatpush3.bf16.msra.mxu0 %v2277_v34 }
 0x38c   :  { %2023 = vmatprep.subr.bf16.mxu0 %v2510_v11 }
 0x38f   :  { %2024 = vmatpush3.bf16.msra.mxu0 %v2278_v35 }
 0x390   :  { %2025 = vmatprep.subr.bf16.mxu0 %v2510_v11 }
 0x393   :  { %2026 = vmatpush3.bf16.msra.mxu0 %v2279_v36 }
 0x394   :  { %2031 = vmatprep.subr.bf16.mxu0 %v2510_v11 }
 0x449   :  { %v1959_v37 = vpop.f32.mrb[4].mxu0 }
 0x44a   :  { %v1960_v39 = vpop.f32.mrb[5].mxu0 }
 0x44b   :  { %v1961_v40 = vadd.f32 %v1960_v39, %v1959_v37  ;;  %v1962_v41 = vpop.f32.mrb[6].mxu0 }
 0x44c   :  { %v1963_v42 = vpop.f32.mrb[7].mxu0 }
 0x44d   :  { %v1495_v43 = vadd.f32 %v1961_v40, %v1874_v38 }
 0x44f   :  { %2304 = vtanh.f32 %v1495_v43 }
 0x459   :  { %v2305_v44 = vpop.eup %2304 }
 0x45a   :  { %v1502_v46 = vpack.c.bf16 %v2305_v44, %v2305_v44 }
 0x45c   :  { %2028 = vmatmul.mubr.bf16.vlgmr.msra.gmra.mrb[8].mxu0 %v1502_v46 }
 0x45d   :  { %2032 = vmatpush3.bf16.msra.mxu0 %v2280_v45  ;;  %2047 = vmatprep.mubr.msk.bf16.mxu0 %vm2511_vm1, %v2510_v11 }
 0x45e   :  { %2033 = vmatprep.subr.bf16.mxu0 %v2510_v11 }
 0x461   :  { %2034 = vmatpush3.bf16.msra.mxu0 %v2281_v47 }
 0x462   :  { %2035 = vmatprep.subr.bf16.mxu0 %v2510_v11 }
 0x465   :  { %2036 = vmatpush3.bf16.msra.mxu0 %v2282_v48 }
 0x466   :  { %2037 = vmatprep.subr.bf16.mxu0 %v2510_v11 }
 0x469   :  { %2038 = vmatpush3.bf16.msra.mxu0 %v2283_v49 }
 0x46a   :  { %2039 = vmatprep.subr.bf16.mxu0 %v2510_v11 }
 0x46d   :  { %2040 = vmatpush3.bf16.msra.mxu0 %v2284_v60 }
 0x46e   :  { %2041 = vmatprep.subr.bf16.mxu0 %v2510_v11 }
 0x471   :  { %2042 = vmatpush3.bf16.msra.mxu0 %v2285_v24 }
 0x472   :  { %2043 = vmatprep.subr.bf16.mxu0 %v2510_v11 }
 0x475   :  { %2044 = vmatpush3.bf16.msra.mxu0 %v2286_v50 }
 0x476   :  { %2045 = vmatprep.subr.bf16.mxu0 %v2510_v11 }
 0x479   :  { %2046 = vmatpush3.bf16.msra.mxu0 %v2287_v51 }
 0x52f   :  { %v1607_v53 = vpop.f32.mrb[8].mxu0 }
 0x530   :  { %v1608_v54 = vadd.f32 %v1891_v52, %v1607_v53  ;;  %v2029_v55 = vpop.f32.mrb[9].mxu0 }
 0x531   :  { %v1610_v56 = vpop.f32.mrb[10].mxu0 }
 0x532   :  { %2306 = vtanh.f32 %v1608_v54  ;;  %v2030_v57 = vpop.f32.mrb[11].mxu0 }
 0x53c   :  { %v2307_v58 = vpop.eup %2306 }
 0x53d   :  { %v1615_v59 = vpack.c.bf16 %v2307_v58, %v2307_v58 }
 0x53f   :  { %2048 = vmatmul.mubr.bf16.vlgmr.msra.gmra.mrb[12].mxu0 %v1615_v59 }
 0x612   :  { %v1720_v11 = vpop.f32.mrb[12].mxu0 }
 0x613   :  { %v1721_v1 = vadd.f32 %v1900_v62, %v1720_v11  ;;  %v2049_v2 = vpop.f32.mrb[13].mxu0 }
 0x614   :  { %v1723_v3 = vpop.f32.mrb[14].mxu0 }
 0x615   :  { %2308 = vtanh.f32 %v1721_v1  ;;  %v2050_v0 = vpop.f32.mrb[15].mxu0 }
 0x61f   :  { %v2309_v4 = vpop.eup %2308 }
 0x620   :  { %1727 = vst [vmem:[#allocation14] sm:$0xff] %v2309_v4 }
 0x621   :  { %2475 = shalt.err (!%p2472_p4)
}
 0x622   :  { %s2476_s15 = scalar_lea.hbm %s2760_s8, 128 }
 0x623   :  { %p2477_p5 = scmp.ne.s32.totalorder %s2760_s8, %s2476_s15  ;;  %p2480_p6 = scmp.lt.u32.totalorder %s2476_s15, %s2760_s8 }
 0x625   :  { %p2482_p7 = pnand %p2480_p6, %p2477_p5 }
 0x627   :  { %2485 = shalt.err (!%p2482_p7)
}
 0x628   :  { %1737 = dma.vmem_to_hbm [thread:$0]  %s1735_s5, 128, %s2760_s8, [#allocation4]  }
 0x629   :  { %2494 = dma.done.wait [#allocation4], 128  }
 0x62a   :  { %2495 = vsyncadd [#allocation4], 4294967168 }
 0x62b   :  { %1741 = vsyncpa [#allocation3], 1 }
 0x62c   :  { %1742 = vsyncpa [#allocation6], 1 }
 0x62d   :  { %1743 = vsyncpa [#allocation9], 1 }
 0x62e   :  { %1744 = vsyncpa [#allocation12], 1 }
 0x62f   :  { %1745 = vsyncpa [#allocation4], 1 }

</bundles_post_ra>
